<compile_context>
chip_gen: v7x
topology: tpu7x:2x2x1
jax: 0.10.0
libtpu: 0.0.40
codegen_flags: <defaults>
</compile_context>

<pallas_src>
import functools

import jax
import jax.numpy as jnp
from jax import lax
from jax.experimental import pallas as pl
from jax.experimental.pallas import tpu as pltpu


def _selfloss_kernel(b_ref, bt_ref, sim_ref, out_ref, *, group):
    j = pl.program_id(1)
    tile_m, tile_n = sim_ref.shape
    ngroups = tile_m // group

    # Per-row-block partial sum accumulates across the inner "arbitrary" j axis.
    @pl.when(j == 0)
    def _():
        out_ref[...] = jnp.zeros_like(out_ref)

    bt_j = bt_ref[...]  # (nbits, tile_n) bf16, lane-dense RHS for the MXU.

    def body(g, acc):
        r0 = pl.multiple_of(g * group, group)
        # (group, nbits) bf16 rows of (1/nbits)*B for this row group.
        b_g = b_ref[pl.ds(r0, group), :]
        # Gram rows on the MXU with f32 accumulation: (group, tile_n).
        gram_g = jnp.dot(b_g, bt_j, preferred_element_type=jnp.float32)
        diff = sim_ref[pl.ds(r0, group), :].astype(jnp.float32) - gram_g
        d2 = diff * diff
        # Fold the group's rows into an 8-row slab with pure VPU adds
        # (static, sublane-aligned slices; no XLU cross-lane reduce).
        part = d2[0:8, :]
        for r in range(1, group // 8):
            part = part + d2[r * 8:(r + 1) * 8, :]
        return acc + part

    acc0 = jnp.zeros((8, tile_n), jnp.float32)
    acc = lax.fori_loop(0, ngroups, body, acc0, unroll=True)
    out_ref[...] += acc


def _largest_divisor(n, upper, mult):
    """Largest d <= upper with n % d == 0 and d % mult == 0, else None."""
    d = min(upper, n)
    d -= d % mult
    while d >= mult:
        if n % d == 0:
            return d
        d -= mult
    return None


def selfloss(B, Sim, *, tile_m=512, tile_n=1024):
    """Pallas TPU implementation of Selfloss.forward(B, Sim) -> scalar."""
    N, nbits = B.shape
    assert Sim.shape == (N, N)
    assert N % 8 == 0, "N must be a multiple of 8"

    # Row-block size: multiple of 16 (bf16 sublane packing), divides N, capped
    # at N/2 so the 'parallel' i axis has >= 2 blocks (v7x megacore).
    cap_m = min(tile_m, N if N < 32 else N // 2)
    tm = _largest_divisor(N, cap_m, 16)
    if tm is None:
        tm = _largest_divisor(N, min(tile_m, N), 8)
    assert tm is not None

    # Column-block size: full width when it fits (contiguous HBM bursts),
    # otherwise the largest multiple-of-128 divisor of N.
    if N <= tile_n:
        tn = N
    else:
        tn = _largest_divisor(N, tile_n, 128)
        if tn is None:
            tn = N  # fallback: full-width row blocks

    # Streaming row-group size: keep ~16 f32 vregs of Sim live per group.
    budget = max(8, (16384 // tn) // 8 * 8)
    group = None
    for g in range(min(tm, budget), 7, -8):
        if tm % g == 0:
            group = g
            break
    assert group is not None

    grid_i = N // tm
    grid_j = N // tn

    # Lane-dense bf16 MXU operands; 1/nbits folded into the small LHS operand.
    # (Exact for +/-1 hash codes and power-of-two nbits, the module's use case.)
    B32 = B.astype(jnp.float32)
    Bs = (B32 * (1.0 / nbits)).astype(jnp.bfloat16)   # (N, nbits)
    Bt = B32.T.astype(jnp.bfloat16)                   # (nbits, N)

    kernel = functools.partial(_selfloss_kernel, group=group)

    partials = pl.pallas_call(
        kernel,
        out_shape=jax.ShapeDtypeStruct((grid_i * 8, tn), jnp.float32),
        grid_spec=pltpu.PrefetchScalarGridSpec(
            num_scalar_prefetch=0,
            grid=(grid_i, grid_j),
            in_specs=[
                # (1/nbits)*B row block; constant across j => fetched once per i.
                pl.BlockSpec((tm, nbits), lambda i, j: (i, 0)),
                # B^T column block (lane-dense bf16 RHS); tiny per-step DMA.
                pl.BlockSpec((nbits, tn), lambda i, j: (0, j)),
                # The single large HBM stream: lane-dense Sim tile.
                pl.BlockSpec((tm, tn), lambda i, j: (i, j)),
            ],
            out_specs=pl.BlockSpec((8, tn), lambda i, j: (i, 0)),
        ),
        compiler_params=pltpu.CompilerParams(
            dimension_semantics=("parallel", "arbitrary"),
            vmem_limit_bytes=32 * 1024 * 1024),
        cost_estimate=pl.CostEstimate(
            flops=2 * N * N * nbits + 3 * N * N,
            transcendentals=0,
            bytes_accessed=4 * N * N + 4 * N * nbits + 4 * grid_i * 8 * tn),
    )(Bs, Bt, Sim.astype(jnp.float32))

    # Tiny epilogue in plain JAX: total sum of squares + sqrt = Frobenius norm.
    return jnp.sqrt(jnp.sum(partials))


if __name__ == "__main__":
    key = jax.random.PRNGKey(0)
    k1, k2 = jax.random.split(key)

    N, nbits = 256, 32  # B: (N, nbits), Sim: (N, N)
    # Synthetic deterministic inputs: binary-like codes and a similarity matrix.
    B = jnp.sign(jax.random.normal(k1, (N, nbits), dtype=jnp.float32))
    B = jnp.where(B == 0, 1.0, B)
    Sim = jax.random.normal(k2, (N, N), dtype=jnp.float32)

    loss = jax.block_until_ready(selfloss(B, Sim))

    # Pure-JAX reference (same semantics as the PyTorch module).
    ref = jnp.linalg.norm(Sim - (1.0 / nbits) * (B @ B.T))
    assert jnp.allclose(loss, ref, rtol=1e-5, atol=1e-5), (loss, ref)

    print("KERNEL_OK")
</pallas_src>

<mosaic_0001>
module attributes {stable_mosaic.version = 11 : i64} {
  func.func @_selfloss_kernel(%arg0: i32, %arg1: i32, %arg2: memref<128x32xbf16, #tpu.memory_space<vmem>>, %arg3: memref<32x256xbf16, #tpu.memory_space<vmem>>, %arg4: memref<128x256xf32, #tpu.memory_space<vmem>>, %arg5: memref<8x256xf32, #tpu.memory_space<vmem>>) attributes {dimension_semantics = [#tpu.dimension_semantics<parallel>, #tpu.dimension_semantics<arbitrary>], iteration_bounds = array<i64: 2, 1>, scalar_prefetch = 0 : i64, scratch_operands = 0 : i64, tpu.core_type = #tpu.core_type<tc>, window_params = [{transform_indices = @transform_0, window_bounds = array<i64: 128, 32>}, {transform_indices = @transform_1, window_bounds = array<i64: 32, 256>}, {transform_indices = @transform_2, window_bounds = array<i64: 128, 256>}, {transform_indices = @transform_3, window_bounds = array<i64: 8, 256>}]} {
    %c0_i32 = arith.constant 0 : i32
    %0 = arith.cmpi eq, %arg1, %c0_i32 : i32
    %1 = arith.extui %0 : i1 to i32
    %c0_i32_0 = arith.constant 0 : i32
    %2 = arith.cmpi ne, %1, %c0_i32_0 : i32
    scf.if %2 {
      %cst_14 = arith.constant 0.000000e+00 : f32
      %58 = vector.broadcast %cst_14 : f32 to vector<8x256xf32>
      %c0_15 = arith.constant 0 : index
      %c0_16 = arith.constant 0 : index
      %59 = vector.load %arg5[%c0_15, %c0_16] : memref<8x256xf32, #tpu.memory_space<vmem>>, vector<8x256xf32>
      tpu.vector_store %arg5[%c0_15, %c0_16], %58 {strides = array<i32>} : memref<8x256xf32, #tpu.memory_space<vmem>>, vector<8x256xf32>,
    } else {
    }
    %c0 = arith.constant 0 : index
    %c0_1 = arith.constant 0 : index
    %3 = vector.load %arg3[%c0, %c0_1] : memref<32x256xbf16, #tpu.memory_space<vmem>>, vector<32x256xbf16>
    %cst = arith.constant 0.000000e+00 : f32
    %4 = vector.broadcast %cst : f32 to vector<8x256xf32>
    %c0_i32_2 = arith.constant 0 : i32
    %c64_i32 = arith.constant 64 : i32
    %5 = arith.muli %c0_i32_2, %c64_i32 : i32
    %6 = tpu.assume_multiple %5, 64 : i32
    %7 = arith.index_cast %6 : i32 to index
    %c0_3 = arith.constant 0 : index
    %8 = vector.load %arg2[%7, %c0_3] : memref<128x32xbf16, #tpu.memory_space<vmem>>, vector<64x32xbf16>
    %cst_4 = arith.constant dense<0.000000e+00> : vector<64x256xf32>
    %9 = tpu.matmul %8, %3, %cst_4 {dimension_numbers = #tpu.dot_dimension_numbers<[1], [0], [0], [1], [0, 0, 1, 1], [], []>} : vector<64x32xbf16>, vector<32x256xbf16>, vector<64x256xf32> -> vector<64x256xf32>
    %10 = arith.index_cast %6 : i32 to index
    %c0_5 = arith.constant 0 : index
    %11 = vector.load %arg4[%10, %c0_5] : memref<128x256xf32, #tpu.memory_space<vmem>>, vector<64x256xf32>
    %12 = arith.subf %11, %9 : vector<64x256xf32>
    %13 = arith.mulf %12, %12 : vector<64x256xf32>
    %14 = vector.extract_strided_slice %13 {offsets = [0, 0], sizes = [8, 256], strides = [1, 1]} : vector<64x256xf32> to vector<8x256xf32>
    %15 = vector.extract_strided_slice %13 {offsets = [8, 0], sizes = [8, 256], strides = [1, 1]} : vector<64x256xf32> to vector<8x256xf32>
    %16 = arith.addf %14, %15 : vector<8x256xf32>
    %17 = vector.extract_strided_slice %13 {offsets = [16, 0], sizes = [8, 256], strides = [1, 1]} : vector<64x256xf32> to vector<8x256xf32>
    %18 = arith.addf %16, %17 : vector<8x256xf32>
    %19 = vector.extract_strided_slice %13 {offsets = [24, 0], sizes = [8, 256], strides = [1, 1]} : vector<64x256xf32> to vector<8x256xf32>
    %20 = arith.addf %18, %19 : vector<8x256xf32>
    %21 = vector.extract_strided_slice %13 {offsets = [32, 0], sizes = [8, 256], strides = [1, 1]} : vector<64x256xf32> to vector<8x256xf32>
    %22 = arith.addf %20, %21 : vector<8x256xf32>
    %23 = vector.extract_strided_slice %13 {offsets = [40, 0], sizes = [8, 256], strides = [1, 1]} : vector<64x256xf32> to vector<8x256xf32>
    %24 = arith.addf %22, %23 : vector<8x256xf32>
    %25 = vector.extract_strided_slice %13 {offsets = [48, 0], sizes = [8, 256], strides = [1, 1]} : vector<64x256xf32> to vector<8x256xf32>
    %26 = arith.addf %24, %25 : vector<8x256xf32>
    %27 = vector.extract_strided_slice %13 {offsets = [56, 0], sizes = [8, 256], strides = [1, 1]} : vector<64x256xf32> to vector<8x256xf32>
    %28 = arith.addf %26, %27 : vector<8x256xf32>
    %29 = arith.addf %4, %28 : vector<8x256xf32>
    %c1_i32 = arith.constant 1 : i32
    %c64_i32_6 = arith.constant 64 : i32
    %30 = arith.muli %c1_i32, %c64_i32_6 : i32
    %31 = tpu.assume_multiple %30, 64 : i32
    %32 = arith.index_cast %31 : i32 to index
    %c0_7 = arith.constant 0 : index
    %33 = vector.load %arg2[%32, %c0_7] : memref<128x32xbf16, #tpu.memory_space<vmem>>, vector<64x32xbf16>
    %cst_8 = arith.constant dense<0.000000e+00> : vector<64x256xf32>
    %34 = tpu.matmul %33, %3, %cst_8 {dimension_numbers = #tpu.dot_dimension_numbers<[1], [0], [0], [1], [0, 0, 1, 1], [], []>} : vector<64x32xbf16>, vector<32x256xbf16>, vector<64x256xf32> -> vector<64x256xf32>
    %35 = arith.index_cast %31 : i32 to index
    %c0_9 = arith.constant 0 : index
    %36 = vector.load %arg4[%35, %c0_9] : memref<128x256xf32, #tpu.memory_space<vmem>>, vector<64x256xf32>
    %37 = arith.subf %36, %34 : vector<64x256xf32>
    %38 = arith.mulf %37, %37 : vector<64x256xf32>
    %39 = vector.extract_strided_slice %38 {offsets = [0, 0], sizes = [8, 256], strides = [1, 1]} : vector<64x256xf32> to vector<8x256xf32>
    %40 = vector.extract_strided_slice %38 {offsets = [8, 0], sizes = [8, 256], strides = [1, 1]} : vector<64x256xf32> to vector<8x256xf32>
    %41 = arith.addf %39, %40 : vector<8x256xf32>
    %42 = vector.extract_strided_slice %38 {offsets = [16, 0], sizes = [8, 256], strides = [1, 1]} : vector<64x256xf32> to vector<8x256xf32>
    %43 = arith.addf %41, %42 : vector<8x256xf32>
    %44 = vector.extract_strided_slice %38 {offsets = [24, 0], sizes = [8, 256], strides = [1, 1]} : vector<64x256xf32> to vector<8x256xf32>
    %45 = arith.addf %43, %44 : vector<8x256xf32>
    %46 = vector.extract_strided_slice %38 {offsets = [32, 0], sizes = [8, 256], strides = [1, 1]} : vector<64x256xf32> to vector<8x256xf32>
    %47 = arith.addf %45, %46 : vector<8x256xf32>
    %48 = vector.extract_strided_slice %38 {offsets = [40, 0], sizes = [8, 256], strides = [1, 1]} : vector<64x256xf32> to vector<8x256xf32>
    %49 = arith.addf %47, %48 : vector<8x256xf32>
    %50 = vector.extract_strided_slice %38 {offsets = [48, 0], sizes = [8, 256], strides = [1, 1]} : vector<64x256xf32> to vector<8x256xf32>
    %51 = arith.addf %49, %50 : vector<8x256xf32>
    %52 = vector.extract_strided_slice %38 {offsets = [56, 0], sizes = [8, 256], strides = [1, 1]} : vector<64x256xf32> to vector<8x256xf32>
    %53 = arith.addf %51, %52 : vector<8x256xf32>
    %54 = arith.addf %29, %53 : vector<8x256xf32>
    %c2_i32 = arith.constant 2 : i32
    %c0_10 = arith.constant 0 : index
    %c0_11 = arith.constant 0 : index
    %55 = vector.load %arg5[%c0_10, %c0_11] : memref<8x256xf32, #tpu.memory_space<vmem>>, vector<8x256xf32>
    %56 = arith.addf %55, %54 : vector<8x256xf32>
    %c0_12 = arith.constant 0 : index
    %c0_13 = arith.constant 0 : index
    %57 = vector.load %arg5[%c0_12, %c0_13] : memref<8x256xf32, #tpu.memory_space<vmem>>, vector<8x256xf32>
    tpu.vector_store %arg5[%c0_12, %c0_13], %56 {strides = array<i32>} : memref<8x256xf32, #tpu.memory_space<vmem>>, vector<8x256xf32>,
    return
  }
  func.func @transform_0(%arg0: i32, %arg1: i32) -> (i32, i32) {
    %c0_i32 = arith.constant 0 : i32
    %c0_i32_0 = arith.constant 0 : i32
    return %arg0, %c0_i32 : i32, i32
  }
  func.func @transform_1(%arg0: i32, %arg1: i32) -> (i32, i32) {
    %c0_i32 = arith.constant 0 : i32
    %c0_i32_0 = arith.constant 0 : i32
    return %c0_i32, %arg1 : i32, i32
  }
  func.func @transform_2(%arg0: i32, %arg1: i32) -> (i32, i32) {
    %c0_i32 = arith.constant 0 : i32
    return %arg0, %arg1 : i32, i32
  }
  func.func @transform_3(%arg0: i32, %arg1: i32) -> (i32, i32) {
    %c0_i32 = arith.constant 0 : i32
    %c0_i32_0 = arith.constant 0 : i32
    return %arg0, %c0_i32 : i32, i32
  }
}

</mosaic_0001>

<bundles_post_ra>
// kernel: tpu_custom_call.1
= control target key start
LH: loop header
LB: loop body
LE: loop exit
PB: predicated region body
PF: predicated region fallthrough
CT: control target
= control target key end

     0   :  { %8 = vsyncpa [#allocation3], 0  ;;  %s1302_s0 = inlined_call_operand.vmem [shape: bf16[256,32], index: 0, kind: input, shape index: {}]   ;;  %s1303_s1 = inlined_call_operand.vmem [shape: bf16[32,256], index: 1, kind: input, shape index: {}]   ;;  %s1304_s2 = inlined_call_operand.hbm [shape: f32[256,256], index: 2, kind: input, shape index: {}]   ;;  %s1305_s3 = inlined_call_operand.hbm [shape: f32[16,256], index: 3, kind: output, shape index: {}]  }
   0x1   :  { %10 = vsyncpa [#allocation3 + $0x1], 0 }
   0x2   :  { %11 = vsyncpa [#allocation4], 0 }
   0x3   :  { %13 = vsyncpa [#allocation4 + $0x1], 0  ;;  %s1060_s12 = smov 0   ;;  %s1062_s13 = smov 0  }
   0x4   :  { %s1064_s14 = smov 0   ;;  %s1066_s15 = smov 0  }
   0x5   :  { %s1068_s16 = smov 0   ;;  %s1070_s17 = smov 0  }
   0x6 LB: > { %s775_s18 = sadd.s32 4294967295, %s1033_s17   ;;  %s776_s19 = sadd.s32 4294967294, %s1033_s17   ;;  %s1033_s17 = sphi %s1070_s17, %s19_s17   ;;  %s1029_s16 = sphi %s1068_s16, %s1320_s16   ;;  %s1025_s15 = sphi %s1066_s15, %s1319_s15   ;;  %s1021_s14 = sphi %s1064_s14, %s1318_s14   ;;  %s1017_s13 = sphi %s1062_s13, %s1317_s13   ;;  %s1013_s12 = sphi %s1060_s12, %s1316_s12  }
   0x7   : > { %s31_s20 = sadd.s32 1, %s1029_s16  ;;  %s92_s21 = sadd.s32 1, %s1021_s14 }
   0x8   : > { %p33_p0 = scmp.ge.s32.totalorder %s31_s20, 2  ;;  %p99_p1 = scmp.ne.s32.totalorder %s1021_s14, %s1017_s13 }
   0x9   : > { %p100_p2 = scmp.eq.s32.totalorder %s1033_s17, 0  ;;  %p105_p3 = scmp.ne.s32.totalorder %s1017_s13, %s1013_s12 }
   0xa   : > { %s1322_s20 = smov (%p33_p0, %s31_s20), 0  ;;  %p106_p5 = scmp.eq.s32.totalorder %s775_s18, 0 }
   0xb   : > { %p1101_p4 = por %p100_p2, %p99_p1  ;;  %s87_s23 = ssub.s32 %s1029_s16, %s1322_s20 }
   0xc   : > { %p129_p6 = scmp.eq.s32.totalorder %s775_s18, 1  ;;  %p90_p7 = scmp.eq.s32.totalorder %s87_s23, 0 }
   0xd   : > { %p1107_p8 = por %p106_p5, %p105_p3  ;;  %p135_p10 = scmp.eq.s32.totalorder %s776_s19, 1 }
   0xe   : > { %p1111_p9 = por %p129_p6, %p99_p1  ;;  %p853_p13 = scmp.lt.s32.totalorder %s1033_s17, 2 }
   0xf   : > { %s1116_s26 = scalar_select %p90_p7, %s1021_s14, %s92_s21  }
  0x10   : > { %s1309_s25 = scalar_select %p1111_p9, 1, 0 }
  0x11   : > { %p1118_p11 = por %p135_p10, %p105_p3  ;;  %s173_s28 = sand.u32 1, %s1021_s14  }
  0x12   : > { %s780_s29 = sshll.u32 %s173_s28, 8  ;;  %s839_s30 = sshll.u32 %s1029_s16, 12 }
  0x13   : > { %s1310_s27 = scalar_select %p1118_p11, 1, 0 }
  0x14   : > { %s1129_s6 = scalar_lea.hbm %s1304_s2, %s839_s30  ;;  %s177_s7 = scalar_lea.vmem [#allocation2], %s780_s29 }
  0x15   : > { %s187_s8 = sshll.u32 %s177_s7, 4  ;;  %p1135_p0 = pnand %p853_p13, %p1101_p4  ;;  %s1131_s8 = int_to_ptr.vmem [resolvable:$true] %s187_s8 }
  0x16   : > { %s1140_s10 = scalar_lea.sflag [#allocation3], %s173_s28  ;;  %s921_s11 = scalar_lea.hbm %s1129_s6, 4096 }
  0x17   : > { %p922_p2 = scmp.ne.s32.totalorder %s1129_s6, %s921_s11  ;;  %p923_p3 = pneg %p1135_p0 }
  0x18   : > { %s926_s21 = scalar_lea.hbm %s1304_s2, 8192  ;;  %p927_p4 = scmp.lt.u32.totalorder %s1129_s6, %s1304_s2 }
  0x19   : > { %p924_p5 = pnand %p923_p3, %p922_p2  ;;  %p928_p7 = scmp.lt.u32.totalorder %s926_s21, %s921_s11 }
  0x1a   : > { %p930_p13 = scmp.lt.u32.totalorder %s921_s11, %s1129_s6 }
  0x1b   : > { %p925_p6 = pneg %p924_p5  ;;  %p929_p10 = por %p928_p7, %p927_p4 }
  0x1d   : > { %p931_p12 = por %p930_p13, %p929_p10 }
  0x1f   : > { %p932_p1 = pnand %p931_p12, %p925_p6 }
  0x21   : > { %935 = shalt.err (!%p932_p1)
}
  0x22   : > { %s936_s28 = scalar_lea.vmem %s1131_s8, 4096  ;;  %s1035_s29 = smov [#allocation2]  }
  0x23   : > { %p937_p2 = scmp.ne.s32.totalorder %s1131_s8, %s936_s28  ;;  %s941_s30 = sshll.u32 %s1035_s29, 4  ;;  %s942_s30 = int_to_ptr.vmem [resolvable:$false] %s941_s30 }
  0x24   : > { %s943_s4 = scalar_lea.vmem %s942_s30, 8192  ;;  %p944_p9 = scmp.lt.s32.totalorder %s1131_s8, %s942_s30 }
  0x25   : > { %p939_p5 = pnand %p937_p2, %p923_p3  ;;  %p945_p4 = scmp.lt.s32.totalorder %s943_s4, %s936_s28 }
  0x27   : > { %p940_p11 = pneg %p939_p5  ;;  %p946_p7 = por %p945_p4, %p944_p9 }
  0x29   : > { %p947_p10 = pnand %p946_p7, %p940_p11 }
  0x2b   : > { %950 = shalt.err (!%p947_p10)
}
  0x2c   : > { %s1036_s5 = smov 256   ;;  %s1037_s7 = smov 16  }
  0x2d   : > { %848 = dma.hbm_to_vmem [thread:$0]  (!%p1135_p0), %s1129_s6, 4096, %s1131_s8, %s1140_s10, %s1036_s5, %s1036_s5, %s1037_s7  }
  0x2e   : > { %p195_p12 = scmp.lt.s32.totalorder %s1033_s17, 3  ;;  %p1312_p1 = scmp.ge.s32.totalorder %s1033_s17, 1 }
  0x30   : > { %p196_p3 = pnand %p1312_p1, %p195_p12 }
  0x31   : > { %s1172_s11 = sand.u32 (!%p196_p3), 1, %s1017_s13  }
  0x32   : > { %199 = sbr.rel (%p196_p3) target bundleno = 329 (0x149), region = 32  ;;  %s785_s18 = sshll.u32 (!%p196_p3), %s1172_s11, 8 }
  0x33   : > { %s202_s19 = scalar_lea.sflag (!%p196_p3), [#allocation3], %s1172_s11  ;;  %s1176_s21 = scalar_lea.vmem (!%p196_p3), [#allocation2], %s785_s18 }
  0x39   : > { %1004 = dma.done.wait (%p1107_p8), %s202_s19, 4096  }
  0x3a   : > { %1006 = vsyncadd (%p1107_p8), %s202_s19, 4294963200  ;;  %s787_s6 = sshll.u32 %s1025_s15, 4  ;;  %v1038_v0 = vmov 0   ;;  %v907_v1 = vld [vmem:[%s1303_s1 + $0x4] ss:$8 sps:$4 sm:$0xff]   ;;  %vm311_vm0 = vcmask 261120  }
  0x3b   : > { %356 = vmatprep.mubr.bf16.mxu0 %v1038_v0  ;;  %537 = vmatprep.mubr.bf16.mxu1 %v1038_v0  ;;  %p239_p9 = scmp.lt.s32.totalorder %s787_s6, 31  ;;  %v909_v2 = vld [vmem:[%s1303_s1] ss:$8 sps:$4 sm:$0xff]   ;;  %v910_v3 = vld [vmem:[%s1303_s1 + $0x14] ss:$8 sps:$4 sm:$0xff]   ;;  %s786_s18 = sshll.u32 %s1172_s11, 4 }
  0x3c   : > { %324 = vmatprep.subr.bf16.mxu0 %v907_v1  ;;  %505 = vmatprep.subr.bf16.mxu1 %v907_v1  ;;  %v912_v4 = vld [vmem:[%s1303_s1 + $0x10] ss:$8 sps:$4 sm:$0xff]   ;;  %v400_v13 = vld [vmem:[%s1176_s21] sm:$0xff]  ;;  %v401_v15 = vld [vmem:[%s1176_s21 + $0x8] sm:$0xff]  ;;  %s840_s19 = sshll.u32 %s1025_s15, 8  ;;  %s652_s22 = scalar_lea.sflag [#allocation4], %s1172_s11 }
  0x3d   : > { %s1324_s6 = smov (!%p239_p9, %s787_s6), 31  ;;  %325 = vmatpush1.bf16.msra.mxu0 %v909_v2  ;;  %506 = vmatpush1.bf16.msra.mxu1 %v909_v2  ;;  %v817_v14 = vld [vmem:[%s1176_s21 + $0x80] sm:$0xff]  ;;  %v818_v16 = vld [vmem:[%s1176_s21 + $0x88] sm:$0xff]  ;;  %v402_v19 = vld [vmem:[%s1176_s21 + $0x10] sm:$0xff]  ;;  %s1253_s10 = scalar_lea.hbm %s1305_s3, %s840_s19 }
  0x3e   : > { %s788_s8 = sshll.u32 %s1324_s6, 2  ;;  %326 = vmatprep.subr.bf16.mxu0 %v910_v3  ;;  %507 = vmatprep.subr.bf16.mxu1 %v910_v3  ;;  %v819_v20 = vld [vmem:[%s1176_s21 + $0x90] sm:$0xff]  ;;  %v403_v25 = vld [vmem:[%s1176_s21 + $0x18] sm:$0xff]  ;;  %v404_v45 = vld [vmem:[%s1176_s21 + $0x20] sm:$0xff]  ;;  %p1313_p11 = scmp.ne.s32.totalorder %s1309_s25, 0 }
  0x3f   : > { %s1192_s24 = scalar_lea.vmem %s1302_s0, %s788_s8  ;;  %v820_v26 = vld [vmem:[%s1176_s21 + $0x98] sm:$0xff]  ;;  %v821_v46 = vld [vmem:[%s1176_s21 + $0xa0] sm:$0xff]  ;;  %v405_v49 = vld [vmem:[%s1176_s21 + $0x28] sm:$0xff]  ;;  %s1039_s15 = smov [#allocation5]  }
  0x40   : > { %v913_v5 = vld [vmem:[%s1192_s24] sm:$0xff]   ;;  %v915_v7 = vld [vmem:[%s1192_s24 + $0x8] sm:$0xff]   ;;  %v917_v9 = vld [vmem:[%s1192_s24 + $0x10] sm:$0xff]   ;;  %s955_s28 = sshll.u32 %s1039_s15, 4  ;;  %s956_s28 = int_to_ptr.vmem [resolvable:$false] %s955_s28 }
  0x41   : > { %v914_v6 = vld [vmem:[%s1192_s24 + $0x20] sm:$0xff]   ;;  %327 = vmatpush1.bf16.msra.mxu0 %v912_v4  ;;  %508 = vmatpush1.bf16.msra.mxu1 %v912_v4  ;;  %v916_v8 = vld [vmem:[%s1192_s24 + $0x28] sm:$0xff]   ;;  %v918_v10 = vld [vmem:[%s1192_s24 + $0x30] sm:$0xff]   ;;  %s957_s29 = scalar_lea.vmem %s956_s28, 512 }
  0x42   : > { %v919_v11 = vld [vmem:[%s1192_s24 + $0x18] sm:$0xff]   ;;  %v822_v50 = vld [vmem:[%s1176_s21 + $0xa8] sm:$0xff]  ;;  %v406_v55 = vld [vmem:[%s1176_s21 + $0x30] sm:$0xff] }
  0x43   : > { %v920_v12 = vld [vmem:[%s1192_s24 + $0x38] sm:$0xff]   ;;  %v823_v56 = vld [vmem:[%s1176_s21 + $0xb0] sm:$0xff] }
  0x44   : > { %797 = vmatmul.mubr.msk.bf16.vlgmr.msra.gmra.mrb[0].mxu0 %vm311_vm0, %v913_v5  ;;  %813 = vmatmul.mubr.msk.bf16.vlgmr.msra.gmra.mrb[0].mxu1 %vm311_vm0, %v914_v6  ;;  %v407_v61 = vld [vmem:[%s1176_s21 + $0x38] sm:$0xff] }
  0x45   : > { %366 = vmatprep.mubr.bf16.mxu0 %v1038_v0  ;;  %547 = vmatprep.mubr.bf16.mxu1 %v1038_v0  ;;  %v824_v62 = vld [vmem:[%s1176_s21 + $0xb8] sm:$0xff] }
  0x4c   : > { %798 = vmatmul.mubr.msk.bf16.gmra.mrb[4].mxu0 %vm311_vm0, %v915_v7  ;;  %814 = vmatmul.mubr.msk.bf16.gmra.mrb[4].mxu1 %vm311_vm0, %v916_v8 }
  0x4d   : > { %376 = vmatprep.mubr.bf16.mxu0 %v1038_v0  ;;  %557 = vmatprep.mubr.bf16.mxu1 %v1038_v0 }
  0x54   : > { %799 = vmatmul.mubr.msk.bf16.gmra.mrb[8].mxu0 %vm311_vm0, %v917_v9  ;;  %815 = vmatmul.mubr.msk.bf16.gmra.mrb[8].mxu1 %vm311_vm0, %v918_v10 }
  0x55   : > { %386 = vmatprep.mubr.bf16.mxu0 %v1038_v0  ;;  %567 = vmatprep.mubr.bf16.mxu1 %v1038_v0 }
  0x5c   : > { %800 = vmatmul.mubr.msk.bf16.gmra.mrb[12].mxu0 %vm311_vm0, %v919_v11  ;;  %816 = vmatmul.mubr.msk.bf16.gmra.mrb[12].mxu1 %vm311_vm0, %v920_v12 }
 0x117   : > { %v358_v17 = vpop.f32.mrb[0].mxu0  ;;  %v539_v18 = vpop.f32.mrb[0].mxu1 }
 0x118   : > { %v416_v21 = vsub.f32 %v400_v13, %v358_v17  ;;  %v597_v22 = vsub.f32 %v817_v14, %v539_v18  ;;  %v360_v23 = vpop.f32.mrb[1].mxu0  ;;  %v541_v24 = vpop.f32.mrb[1].mxu1 }
 0x119   : > { %v417_v27 = vsub.f32 %v401_v15, %v360_v23  ;;  %v598_v28 = vsub.f32 %v818_v16, %v541_v24  ;;  %v362_v29 = vpop.f32.mrb[2].mxu0  ;;  %v543_v30 = vpop.f32.mrb[2].mxu1 }
 0x11a   : > { %v418_v31 = vsub.f32 %v402_v19, %v362_v29  ;;  %v599_v32 = vsub.f32 %v819_v20, %v543_v30  ;;  %v364_v33 = vpop.f32.mrb[3].mxu0  ;;  %v545_v34 = vpop.f32.mrb[3].mxu1  ;;  %v432_v37 = vmul.f32 %v416_v21, %v416_v21  ;;  %v613_v38 = vmul.f32 %v597_v22, %v597_v22  ;;  %v408_v21 = vld [vmem:[%s1176_s21 + $0x40] sm:$0xff] }
 0x11b   : > { %v419_v35 = vsub.f32 %v403_v25, %v364_v33  ;;  %v600_v36 = vsub.f32 %v820_v26, %v545_v34  ;;  %v433_v41 = vmul.f32 %v417_v27, %v417_v27  ;;  %v614_v42 = vmul.f32 %v598_v28, %v598_v28  ;;  %v825_v22 = vld [vmem:[%s1176_s21 + $0xc0] sm:$0xff]  ;;  %v409_v25 = vld [vmem:[%s1176_s21 + $0x48] sm:$0xff] }
 0x11c   : > { %v434_v39 = vmul.f32 %v418_v31, %v418_v31  ;;  %v615_v40 = vmul.f32 %v599_v32, %v599_v32  ;;  %v826_v26 = vld [vmem:[%s1176_s21 + $0xc8] sm:$0xff]  ;;  %v410_v31 = vld [vmem:[%s1176_s21 + $0x50] sm:$0xff] }
 0x11d   : > { %v435_v43 = vmul.f32 %v419_v35, %v419_v35  ;;  %v616_v44 = vmul.f32 %v600_v36, %v600_v36  ;;  %v827_v32 = vld [vmem:[%s1176_s21 + $0xd0] sm:$0xff] }
 0x11e   : > { %v448_v47 = vadd.f32 %v434_v39, %v432_v37  ;;  %v629_v48 = vadd.f32 %v615_v40, %v613_v38  ;;  %v411_v37 = vld [vmem:[%s1176_s21 + $0x58] sm:$0xff] }
 0x11f   : > { %v449_v51 = vadd.f32 %v435_v43, %v433_v41  ;;  %v630_v52 = vadd.f32 %v616_v44, %v614_v42  ;;  %v368_v53 = vpop.f32.mrb[4].mxu0  ;;  %v549_v54 = vpop.f32.mrb[4].mxu1  ;;  %v828_v38 = vld [vmem:[%s1176_s21 + $0xd8] sm:$0xff] }
 0x120   : > { %v420_v57 = vsub.f32 %v404_v45, %v368_v53  ;;  %v601_v58 = vsub.f32 %v821_v46, %v549_v54  ;;  %v370_v59 = vpop.f32.mrb[5].mxu0  ;;  %v551_v60 = vpop.f32.mrb[5].mxu1 }
 0x121   : > { %v421_v63 = vsub.f32 %v405_v49, %v370_v59  ;;  %v602_v0 = vsub.f32 %v822_v50, %v551_v60  ;;  %v372_v1 = vpop.f32.mrb[6].mxu0  ;;  %v553_v2 = vpop.f32.mrb[6].mxu1 }
 0x122   : > { %v436_v3 = vmul.f32 %v420_v57, %v420_v57  ;;  %v617_v4 = vmul.f32 %v601_v58, %v601_v58  ;;  %v422_v5 = vsub.f32 %v406_v55, %v372_v1  ;;  %v603_v6 = vsub.f32 %v823_v56, %v553_v2  ;;  %v374_v7 = vpop.f32.mrb[7].mxu0  ;;  %v555_v8 = vpop.f32.mrb[7].mxu1  ;;  %v413_v1 = vld [vmem:[%s1176_s21 + $0x68] sm:$0xff] }
 0x123   : > { %v437_v9 = vmul.f32 %v421_v63, %v421_v63  ;;  %v618_v10 = vmul.f32 %v602_v0, %v602_v0  ;;  %v423_v11 = vsub.f32 %v407_v61, %v374_v7  ;;  %v604_v12 = vsub.f32 %v824_v62, %v555_v8  ;;  %v412_v61 = vld [vmem:[%s1176_s21 + $0x60] sm:$0xff]  ;;  %v830_v2 = vld [vmem:[%s1176_s21 + $0xe8] sm:$0xff]  ;;  %v414_v7 = vld [vmem:[%s1176_s21 + $0x70] sm:$0xff] }
 0x124   : > { %v450_v13 = vadd.f32 %v448_v47, %v436_v3  ;;  %v631_v14 = vadd.f32 %v629_v48, %v617_v4  ;;  %v438_v15 = vmul.f32 %v422_v5, %v422_v5  ;;  %v619_v16 = vmul.f32 %v603_v6, %v603_v6  ;;  %v829_v62 = vld [vmem:[%s1176_s21 + $0xe0] sm:$0xff]  ;;  %v831_v8 = vld [vmem:[%s1176_s21 + $0xf0] sm:$0xff] }
 0x125   : > { %v451_v17 = vadd.f32 %v449_v51, %v437_v9  ;;  %v632_v18 = vadd.f32 %v630_v52, %v618_v10  ;;  %v439_v19 = vmul.f32 %v423_v11, %v423_v11  ;;  %v620_v20 = vmul.f32 %v604_v12, %v604_v12 }
 0x126   : > { %v452_v23 = vadd.f32 %v450_v13, %v438_v15  ;;  %v633_v24 = vadd.f32 %v631_v14, %v619_v16  ;;  %v415_v13 = vld [vmem:[%s1176_s21 + $0x78] sm:$0xff] }
 0x127   : > { %v453_v27 = vadd.f32 %v451_v17, %v439_v19  ;;  %v634_v28 = vadd.f32 %v632_v18, %v620_v20  ;;  %v378_v29 = vpop.f32.mrb[8].mxu0  ;;  %v559_v30 = vpop.f32.mrb[8].mxu1  ;;  %v832_v14 = vld [vmem:[%s1176_s21 + $0xf8] sm:$0xff]  ;;  %s237_s21 = scalar_lea.vmem [#allocation5], %s786_s18 }
 0x128   : > { %v424_v33 = vsub.f32 %v408_v21, %v378_v29  ;;  %v605_v34 = vsub.f32 %v825_v22, %v559_v30  ;;  %v380_v35 = vpop.f32.mrb[9].mxu0  ;;  %v561_v36 = vpop.f32.mrb[9].mxu1  ;;  %s666_s6 = sshll.u32 %s237_s21, 4  ;;  %s1255_s6 = int_to_ptr.vmem [resolvable:$true] %s666_s6 }
 0x129   : > { %v425_v39 = vsub.f32 %v409_v25, %v380_v35  ;;  %v606_v40 = vsub.f32 %v826_v26, %v561_v36  ;;  %v382_v41 = vpop.f32.mrb[10].mxu0  ;;  %v563_v42 = vpop.f32.mrb[10].mxu1  ;;  %s951_s23 = scalar_lea.vmem %s1255_s6, 256  ;;  %p958_p13 = scmp.lt.s32.totalorder %s1255_s6, %s956_s28 }
 0x12a   : > { %v440_v43 = vmul.f32 %v424_v33, %v424_v33  ;;  %v621_v44 = vmul.f32 %v605_v34, %v605_v34  ;;  %v426_v45 = vsub.f32 %v410_v31, %v382_v41  ;;  %v607_v46 = vsub.f32 %v827_v32, %v563_v42  ;;  %v384_v47 = vpop.f32.mrb[11].mxu0  ;;  %v565_v48 = vpop.f32.mrb[11].mxu1  ;;  %p952_p8 = scmp.ne.s32.totalorder %s1255_s6, %s951_s23  ;;  %p959_p2 = scmp.lt.s32.totalorder %s957_s29, %s951_s23 }
 0x12b   : > { %v441_v49 = vmul.f32 %v425_v39, %v425_v39  ;;  %v622_v50 = vmul.f32 %v606_v40, %v606_v40  ;;  %v427_v51 = vsub.f32 %v411_v37, %v384_v47  ;;  %v608_v52 = vsub.f32 %v828_v38, %v565_v48 }
 0x12c   : > { %v454_v53 = vadd.f32 %v452_v23, %v440_v43  ;;  %v635_v54 = vadd.f32 %v633_v24, %v621_v44  ;;  %v442_v55 = vmul.f32 %v426_v45, %v426_v45  ;;  %v623_v56 = vmul.f32 %v607_v46, %v607_v46  ;;  %p953_p0 = pnand %p952_p8, %p1313_p11  ;;  %p960_p5 = por %p959_p2, %p958_p13 }
 0x12d   : > { %v455_v57 = vadd.f32 %v453_v27, %v441_v49  ;;  %v636_v58 = vadd.f32 %v634_v28, %v622_v50  ;;  %v443_v59 = vmul.f32 %v427_v51, %v427_v51  ;;  %v624_v60 = vmul.f32 %v608_v52, %v608_v52 }
 0x12e   : > { %v456_v63 = vadd.f32 %v454_v53, %v442_v55  ;;  %v637_v0 = vadd.f32 %v635_v54, %v623_v56  ;;  %p954_p6 = pneg %p953_p0 }
 0x12f   : > { %v457_v3 = vadd.f32 %v455_v57, %v443_v59  ;;  %v638_v4 = vadd.f32 %v636_v58, %v624_v60  ;;  %v388_v5 = vpop.f32.mrb[12].mxu0  ;;  %v569_v6 = vpop.f32.mrb[12].mxu1 }
 0x130   : > { %v428_v9 = vsub.f32 %v412_v61, %v388_v5  ;;  %v609_v10 = vsub.f32 %v829_v62, %v569_v6  ;;  %v390_v11 = vpop.f32.mrb[13].mxu0  ;;  %v571_v12 = vpop.f32.mrb[13].mxu1  ;;  %p961_p4 = pnand %p960_p5, %p954_p6 }
 0x131   : > { %v429_v15 = vsub.f32 %v413_v1, %v390_v11  ;;  %v610_v16 = vsub.f32 %v830_v2, %v571_v12  ;;  %v392_v17 = vpop.f32.mrb[14].mxu0  ;;  %v573_v18 = vpop.f32.mrb[14].mxu1 }
 0x132   : > { %v444_v19 = vmul.f32 %v428_v9, %v428_v9  ;;  %v625_v20 = vmul.f32 %v609_v10, %v609_v10  ;;  %v430_v21 = vsub.f32 %v414_v7, %v392_v17  ;;  %v611_v22 = vsub.f32 %v831_v8, %v573_v18  ;;  %v394_v23 = vpop.f32.mrb[15].mxu0  ;;  %v575_v24 = vpop.f32.mrb[15].mxu1 }
 0x133   : > { %v445_v25 = vmul.f32 %v429_v15, %v429_v15  ;;  %v626_v26 = vmul.f32 %v610_v16, %v610_v16  ;;  %v431_v27 = vsub.f32 %v415_v13, %v394_v23  ;;  %v612_v28 = vsub.f32 %v832_v14, %v575_v24 }
 0x134   : > { %v458_v29 = vadd.f32 %v456_v63, %v444_v19  ;;  %v639_v30 = vadd.f32 %v637_v0, %v625_v20  ;;  %v446_v31 = vmul.f32 %v430_v21, %v430_v21  ;;  %v627_v32 = vmul.f32 %v611_v22, %v611_v22 }
 0x135   : > { %v459_v33 = vadd.f32 %v457_v3, %v445_v25  ;;  %v640_v34 = vadd.f32 %v638_v4, %v626_v26  ;;  %v447_v35 = vmul.f32 %v431_v27, %v431_v27  ;;  %v628_v36 = vmul.f32 %v612_v28, %v612_v28 }
 0x136   : > { %v460_v37 = vadd.f32 %v458_v29, %v446_v31  ;;  %v641_v38 = vadd.f32 %v639_v30, %v627_v32 }
 0x137   : > { %v461_v39 = vadd.f32 %v459_v33, %v447_v35  ;;  %v642_v40 = vadd.f32 %v640_v34, %v628_v36 }
 0x138   : > { %v643_v41 = vadd.f32 %v641_v38, %v460_v37 }
 0x139   : > { %v644_v42 = vadd.f32 %v642_v40, %v461_v39 }
 0x13a   : > { %649 = vst [vmem:[%s237_s21] sm:$0xff] %v643_v41 }
 0x13b   : > { %650 = vst [vmem:[%s237_s21 + $0x8] sm:$0xff] %v644_v42 }
 0x13c   : > { %964 = shalt.err (!%p961_p4)
}
 0x13d   : > { %s965_s11 = scalar_lea.hbm %s1253_s10, 256  ;;  %s969_s4 = scalar_lea.hbm %s1305_s3, 512 }
 0x13e   : > { %p966_p7 = scmp.ne.s32.totalorder %s1253_s10, %s965_s11  ;;  %p970_p1 = scmp.lt.u32.totalorder %s1253_s10, %s1305_s3 }
 0x13f   : > { %p971_p3 = scmp.lt.u32.totalorder %s969_s4, %s965_s11  ;;  %p973_p8 = scmp.lt.u32.totalorder %s965_s11, %s1253_s10 }
 0x140   : > { %p967_p10 = pnand %p966_p7, %p1313_p11 }
 0x141   : > { %p972_p9 = por %p971_p3, %p970_p1 }
 0x142   : > { %p968_p12 = pneg %p967_p10 }
 0x143   : > { %p974_p0 = por %p973_p8, %p972_p9 }
 0x145   : > { %p975_p6 = pnand %p974_p0, %p968_p12 }
 0x147   : > { %978 = shalt.err (!%p975_p6)
}
 0x148   : > { %843 = dma.vmem_to_hbm [thread:$0]  (%p1313_p11), %s1255_s6, 256, %s1253_s10, %s652_s22  }
 0x149 PF: > { %s678_s18 = sand.u32 1, %s1013_s12   ;;  %p1314_p13 = scmp.ne.s32.totalorder %s1310_s27, 0 }
 0x14a   : > { %p1315_p2 = scmp.ge.s32.totalorder %s1033_s17, 2  ;;  %s679_s19 = scalar_lea.sflag [#allocation4], %s678_s18 }
 0x14c   : > { %p850_p5 = pnand %p1315_p2, %p1314_p13 }
 0x14e   : > { %1008 = dma.done.wait (!%p850_p5), %s679_s19, 256  }
 0x14f   : > { %1010 = vsyncadd (!%p850_p5), %s679_s19, 4294967040  ;;  %s19_s17 = sadd.s32 1, %s1033_s17   ;;  %s1316_s12 = smov %s1017_s13 }
 0x150   : > { %p16_p4 = scmp.ge.s32.totalorder %s19_s17, 4   ;;  %s1317_s13 = smov %s1021_s14 }
 0x151   : > { %s1318_s14 = smov %s1116_s26  ;;  %s1319_s15 = smov %s1029_s16 }
 0x152   : > { %s1320_s16 = smov %s1322_s20  ;;  %18 = sbr.rel (!%p16_p4) target bundleno = 6 (0x6), region = 90 }
 0x159   :  { %684 = vsyncpa [#allocation3], 1 }
 0x15a   :  { %686 = vsyncpa [#allocation3 + $0x1], 1 }
 0x15b   :  { %687 = vsyncpa [#allocation4], 1 }
 0x15c   :  { %689 = vsyncpa [#allocation4 + $0x1], 1 }

</bundles_post_ra>
